<compile_context>
chip_gen: v5e
topology: v5e:2x2
jax: 0.10.0
libtpu: 0.0.40
codegen_flags: <defaults>
</compile_context>

<pallas_src>
import functools

import jax
import jax.numpy as jnp
from jax import lax
from jax.experimental import pallas as pl
from jax.experimental.pallas import tpu as pltpu


def _pick_tile(dim, candidates):
    """Largest candidate tile that evenly divides `dim`, else the full dim."""
    for c in candidates:
        if dim >= c and dim % c == 0:
            return c
    return dim


# -----------------------------------------------------------------------------
# Pallas kernel 1: tiled matmul, bf16 operands (cast in-kernel), f32 accumulation
#   (receptance/key/value/output projections)
# -----------------------------------------------------------------------------
def _matmul_kernel(x_ref, w_ref, o_ref, acc_ref):
    @pl.when(pl.program_id(2) == 0)
    def _():
        acc_ref[...] = jnp.zeros_like(acc_ref)

    # bf16 cast happens on the VMEM tile, so HBM traffic is a single f32 read per
    # element (no separate XLA cast pass of f32-read + bf16-write + bf16-read).
    acc_ref[...] += jnp.dot(x_ref[...].astype(jnp.bfloat16),
                            w_ref[...].astype(jnp.bfloat16),
                            preferred_element_type=jnp.float32)

    @pl.when(pl.program_id(2) == pl.num_programs(2) - 1)
    def _():
        o_ref[...] = acc_ref[...].astype(o_ref.dtype)


def pallas_linear(z, W):
    """z: (..., Cin) @ W: (Cin, Cout) -> (..., Cout) f32; bf16 operands, f32 accum."""
    x2 = z.reshape(-1, z.shape[-1])
    M, K = x2.shape
    _, Nout = W.shape
    # tm capped (<=512) so realistic M keeps >=2 blocks on a parallel axis (v7x 2 TCs);
    # tk/tn prefer 256-multiples (v6e/v7x MXU passes are 256 wide).
    tm = _pick_tile(M, (512, 256, 128, 64, 32, 16, 8))
    tk = _pick_tile(K, (512, 256, 128))
    tn = _pick_tile(Nout, (512, 256, 128))
    out = pl.pallas_call(
        _matmul_kernel,
        out_shape=jax.ShapeDtypeStruct((M, Nout), jnp.float32),
        grid=(M // tm, Nout // tn, K // tk),
        in_specs=[pl.BlockSpec((tm, tk), lambda i, j, k: (i, k)),
                  pl.BlockSpec((tk, tn), lambda i, j, k: (k, j))],
        out_specs=pl.BlockSpec((tm, tn), lambda i, j, k: (i, j)),
        scratch_shapes=[pltpu.VMEM((tm, tn), jnp.float32)],
        compiler_params=pltpu.CompilerParams(
            dimension_semantics=("parallel", "parallel", "arbitrary")),
    )(x2, W)
    return out.reshape(z.shape[:-1] + (Nout,))


def ref_linear(z, W):
    # Same numerics as the Pallas path (bf16 operands, f32 accumulation).
    return jnp.dot(z.astype(jnp.bfloat16), W.astype(jnp.bfloat16),
                   preferred_element_type=jnp.float32)


# -----------------------------------------------------------------------------
# Pallas kernel 2: fused LoRA chain  x @ W1 -> (tanh|sigmoid|id) -> @ W2
#   The (tm, D_lora) intermediate never leaves VMEM (no HBM round trip, no
#   lane-sparse D_lora-wide output tiles).
# -----------------------------------------------------------------------------
def _lora_kernel(x_ref, w1_ref, w2_ref, o_ref, *, act):
    x = x_ref[...].astype(jnp.bfloat16)
    h = jnp.dot(x, w1_ref[...].astype(jnp.bfloat16),
                preferred_element_type=jnp.float32)
    if act == "tanh":
        h = jnp.tanh(h)
    elif act == "sigmoid":
        h = jax.nn.sigmoid(h)
    o_ref[...] = jnp.dot(h.astype(jnp.bfloat16), w2_ref[...].astype(jnp.bfloat16),
                         preferred_element_type=jnp.float32)


def pallas_lora(z, W1, W2, act=None):
    x2 = z.reshape(-1, z.shape[-1])
    M, C = x2.shape
    D = W1.shape[1]
    Cout = W2.shape[1]
    tm = _pick_tile(M, (512, 256, 128, 64, 32, 16, 8))
    out = pl.pallas_call(
        functools.partial(_lora_kernel, act=act),
        out_shape=jax.ShapeDtypeStruct((M, Cout), jnp.float32),
        grid=(M // tm,),
        in_specs=[pl.BlockSpec((tm, C), lambda i: (i, 0)),
                  pl.BlockSpec((C, D), lambda i: (0, 0)),
                  pl.BlockSpec((D, Cout), lambda i: (0, 0))],
        out_specs=pl.BlockSpec((tm, Cout), lambda i: (i, 0)),
        compiler_params=pltpu.CompilerParams(dimension_semantics=("parallel",)),
    )(x2, W1, W2)
    return out.reshape(z.shape[:-1] + (Cout,))


def ref_lora(z, W1, W2, act=None):
    h = ref_linear(z, W1)
    if act == "tanh":
        h = jnp.tanh(h)
    elif act == "sigmoid":
        h = jax.nn.sigmoid(h)
    return ref_linear(h, W2)


# -----------------------------------------------------------------------------
# Pallas kernel 3: RWKV-7 state recurrence (RUN_RWKV7_STATE), all heads per step.
#   Packed state S (N, H*N): S[i, h*N + j] = S_h[value_i, key_j].
#   Per timestep (all heads at once, C = H*N lanes):
#     d      = exp(-exp(w))                       (precomputed per chunk)
#     sa     = grouped(S * a)                     (per-head reduce over key lanes,
#                                                  broadcast back; 2 small MXU dots)
#     v_col  = grouped(sel * v)                   (per-head column form of v)
#     S      = S * d + sa * b + v_col * k
#     o      = sel-diagonal of grouped(S * r)     (back to the (1, C) row layout)
# -----------------------------------------------------------------------------
def _rwkv7_chunk_kernel(r_ref, w_ref, k_ref, a_ref, b_ref, v_ref, s0_ref,
                        o_ref, state, d_scr, *, n_head, head_size, unroll):
    H, N = n_head, head_size
    C = H * N
    hp = lax.Precision.HIGHEST  # 0/1 matrices: keeps the f32 state exact on the MXU

    @pl.when(pl.program_id(1) == 0)
    def _():
        state[...] = s0_ref[...]

    # Decay hoisted out of the serial time loop: one EUP pass per chunk.
    d_scr[...] = jnp.exp(-jnp.exp(w_ref[...]))

    # Grouped reduce / broadcast / select masks.  Built once per grid step (cost is
    # amortized over t_chunk timesteps); not cached in scratch so both megacore TCs
    # stay correct without an init grid point.
    gh = (lax.broadcasted_iota(jnp.int32, (C, H), 0) // N ==
          lax.broadcasted_iota(jnp.int32, (C, H), 1)).astype(jnp.float32)     # (C, H)
    gh_t = (lax.broadcasted_iota(jnp.int32, (H, C), 1) // N ==
            lax.broadcasted_iota(jnp.int32, (H, C), 0)).astype(jnp.float32)   # (H, C)
    sel = (lax.broadcasted_iota(jnp.int32, (N, C), 1) % N ==
           lax.broadcasted_iota(jnp.int32, (N, C), 0)).astype(jnp.float32)    # (N, C)

    t_chunk = r_ref.shape[0]

    def grouped(x):  # per-head reduce over key lanes, then broadcast back: (N,C)->(N,C)
        red = jnp.dot(x, gh, precision=hp, preferred_element_type=jnp.float32)
        return jnp.dot(red, gh_t, precision=hp, preferred_element_type=jnp.float32)

    def body(t, carry):
        sl = pl.ds(t, 1)
        r_t = r_ref[sl, :]                                   # (1, C)
        k_t = k_ref[sl, :]
        a_t = a_ref[sl, :]
        b_t = b_ref[sl, :]
        v_t = v_ref[sl, :]
        d_t = d_scr[sl, :]

        S = state[...]                                       # (N, C)
        sa = grouped(S * a_t)                                # sa_h[i] bcast over head lanes
        v_col = grouped(sel * v_t)                           # v_h[i] bcast over head lanes
        S = S * d_t + sa * b_t + v_col * k_t
        state[...] = S

        o_exp = grouped(S * r_t)                             # o_h[i] bcast over head lanes
        o_ref[sl, :] = jnp.sum(o_exp * sel, axis=0, keepdims=True)  # (1, C) row, head-major
        return carry

    lax.fori_loop(0, t_chunk, body, 0, unroll=unroll)


def rwkv7_state_pallas(r, w, k, a, b, v, s0_packed, *, n_head, head_size):
    """r,w,k,a,b,v: (B, T, C) head-major; s0_packed: (N, C). Returns (B, T, C)."""
    B, T, C = r.shape
    N = head_size
    # 6 double-buffered input streams + output + d scratch: 256 rows x C=1024 f32 stays
    # well under the default scoped-VMEM budget (and v7x's 64 MiB physical VMEM).
    t_chunk = _pick_tile(T, (256, 128, 64, 32, 16, 8))
    unroll = 4 if t_chunk % 4 == 0 else 1
    row_spec = pl.BlockSpec((None, t_chunk, C), lambda bi, ci: (bi, ci, 0))
    s0_spec = pl.BlockSpec((N, C), lambda bi, ci: (0, 0))
    kern = functools.partial(_rwkv7_chunk_kernel, n_head=n_head,
                             head_size=head_size, unroll=unroll)
    return pl.pallas_call(
        kern,
        out_shape=jax.ShapeDtypeStruct((B, T, C), jnp.float32),
        grid=(B, T // t_chunk),
        in_specs=[row_spec, row_spec, row_spec, row_spec, row_spec, row_spec, s0_spec],
        out_specs=row_spec,
        scratch_shapes=[pltpu.VMEM((N, C), jnp.float32),          # packed state
                        pltpu.VMEM((t_chunk, C), jnp.float32)],   # hoisted decay
        compiler_params=pltpu.CompilerParams(
            dimension_semantics=("parallel", "arbitrary")),
    )(r, w, k, a, b, v, s0_packed)


def rwkv7_state_ref(r, w, k, a, b, v, s0, *, n_head, head_size):
    """Pure-JAX reference of the same recurrence (for correctness check)."""
    B, T, C = r.shape
    H, N = n_head, head_size
    rs = lambda z: z.reshape(B, T, H, N)
    r4, w4, k4, a4, b4, v4 = rs(r), rs(w), rs(k), rs(a), rs(b), rs(v)
    d4 = jnp.exp(-jnp.exp(w4))

    def step(state, inp):
        r_t, d_t, k_t, v_t, a_t, b_t = inp                       # each (B, H, N)
        sa = jnp.sum(state * a_t[:, :, None, :], axis=-1)        # (B, H, N)
        state = (state * d_t[:, :, None, :]
                 + sa[..., None] * b_t[:, :, None, :]
                 + v_t[..., None] * k_t[:, :, None, :])
        o_t = jnp.sum(state * r_t[:, :, None, :], axis=-1)
        return state, o_t

    tm = lambda z: jnp.moveaxis(z, 1, 0)                         # (T, B, H, N)
    s0b = jnp.broadcast_to(s0[None], (B, H, N, N))
    _, outs = lax.scan(step, s0b, (tm(r4), tm(d4), tm(k4), tm(v4), tm(a4), tm(b4)))
    return jnp.moveaxis(outs, 0, 1).reshape(B, T, C)


# -----------------------------------------------------------------------------
# Pallas kernel 4: GroupNorm(H, C) fused with the post-attention epilogue
#   y = GN(x) ; y += (sum_head(r*k*r_k) per head) * v ; y *= g ; emit bf16.
# -----------------------------------------------------------------------------
def _gn_epilogue_kernel(x_ref, r_ref, k_ref, v_ref, g_ref,
                        gam_ref, bet_ref, rk_ref, o_ref, *, n_head, eps):
    x = x_ref[...]                                    # (tr, C)
    C = x.shape[-1]
    N = C // n_head
    red = lax.Precision.HIGHEST   # true reductions (mean/var/bonus): keep exact
    bcast = lax.Precision.HIGH    # 0/1 broadcast-back dots: bf16x3 is plenty (v5e relief)
    gmat = (lax.broadcasted_iota(jnp.int32, (C, n_head), 0) // N ==
            lax.broadcasted_iota(jnp.int32, (C, n_head), 1)).astype(jnp.float32)
    gmat_t = (lax.broadcasted_iota(jnp.int32, (n_head, C), 1) // N ==
              lax.broadcasted_iota(jnp.int32, (n_head, C), 0)).astype(jnp.float32)
    inv_n = jnp.float32(1.0 / N)

    mean = jnp.dot(x, gmat, precision=red, preferred_element_type=jnp.float32) * inv_n
    mean_f = jnp.dot(mean, gmat_t, precision=bcast, preferred_element_type=jnp.float32)
    xc = x - mean_f
    var = jnp.dot(xc * xc, gmat, precision=red,
                  preferred_element_type=jnp.float32) * inv_n
    inv_f = jnp.dot(lax.rsqrt(var + eps), gmat_t, precision=bcast,
                    preferred_element_type=jnp.float32)
    y = xc * inv_f * gam_ref[...] + bet_ref[...]

    # per-head bonus: sum_head(r*k*r_k) broadcast over the head's channels, times v
    s = jnp.dot(r_ref[...] * k_ref[...] * rk_ref[...], gmat, precision=red,
                preferred_element_type=jnp.float32)                       # (tr, H)
    y = y + jnp.dot(s, gmat_t, precision=bcast,
                    preferred_element_type=jnp.float32) * v_ref[...]
    o_ref[...] = (y * g_ref[...]).astype(o_ref.dtype)  # gating, bf16 out for Wo matmul


def pallas_gn_epilogue(xo, r, k, v, g, gamma, beta, r_k, *, n_head, eps):
    BT, C = xo.shape
    tr = _pick_tile(BT, (256, 128, 64, 32, 16, 8))
    row_spec = pl.BlockSpec((tr, C), lambda i: (i, 0))
    vec_spec = pl.BlockSpec((1, C), lambda i: (0, 0))
    return pl.pallas_call(
        functools.partial(_gn_epilogue_kernel, n_head=n_head, eps=eps),
        out_shape=jax.ShapeDtypeStruct((BT, C), jnp.bfloat16),
        grid=(BT // tr,),
        in_specs=[row_spec, row_spec, row_spec, row_spec, row_spec,
                  vec_spec, vec_spec, vec_spec],
        out_specs=row_spec,
        compiler_params=pltpu.CompilerParams(dimension_semantics=("parallel",)),
    )(xo, r, k, v, g, gamma.reshape(1, C), beta.reshape(1, C), r_k.reshape(1, C))


def ref_groupnorm(x_bt_c, gamma, beta, H, eps):
    BT, C = x_bt_c.shape
    N = C // H
    xg = x_bt_c.reshape(BT, H, N)
    mean = jnp.mean(xg, axis=-1, keepdims=True)
    var = jnp.mean((xg - mean) ** 2, axis=-1, keepdims=True)
    y = (xg - mean) * lax.rsqrt(var + eps)
    y = y * gamma.reshape(1, H, N) + beta.reshape(1, H, N)
    return y.reshape(BT, C)


# -----------------------------------------------------------------------------
# Parameter init (deterministic; shapes mirror RWKV_Tmix_x070_State.__init__)
# -----------------------------------------------------------------------------
def init_params(key, C, H, N, layer_id, n_layer):
    ratio_0_to_1 = layer_id / (n_layer - 1) if n_layer > 1 else 0.0
    ratio_1_to_almost0 = 1.0 - layer_id / n_layer
    ddd = jnp.arange(C, dtype=jnp.float32) / C

    def lora_dim(f):
        return max(32, int(round(f / 32) * 32))

    D_DECAY = lora_dim(1.8 * C ** 0.5)
    D_AAA = lora_dim(1.8 * C ** 0.5)
    D_MV = lora_dim(1.3 * C ** 0.5)
    D_GATE = 128 if C == 1024 else lora_dim(0.6 * C ** 0.8)

    ks = jax.random.split(key, 16)
    nrm = lambda k, shp, s: s * jax.random.normal(k, shp, dtype=jnp.float32)

    decay_speed = -7.0 + 5.0 * (jnp.arange(C, dtype=jnp.float32) / (C - 1)) ** (
        0.85 + 1.0 * ratio_0_to_1 ** 0.5)

    # NOTE: torch inits the LoRA "1" matrices to zeros and "2" to orthogonal; here we use
    # small deterministic random values so the LoRA paths are non-trivial.
    p = {
        'x_r': 1.0 - ddd ** (0.2 * ratio_1_to_almost0),
        'x_w': 1.0 - ddd ** (0.9 * ratio_1_to_almost0),
        'x_k': 1.0 - (ddd ** (0.9 * ratio_1_to_almost0) + 0.4 * ratio_0_to_1),
        'x_v': 1.0 - (ddd ** (0.4 * ratio_1_to_almost0) + 0.6 * ratio_0_to_1),
        'x_a': 1.0 - ddd ** (0.9 * ratio_1_to_almost0),
        'x_g': 1.0 - ddd ** (0.2 * ratio_1_to_almost0),
        'w0': decay_speed + 0.5,
        'w1': nrm(ks[0], (C, D_DECAY), 0.1),
        'w2': nrm(ks[1], (D_DECAY, C), 0.1),
        'a0': jnp.zeros((C,), jnp.float32),
        'a1': nrm(ks[2], (C, D_AAA), 0.1),
        'a2': nrm(ks[3], (D_AAA, C), 0.1),
        'v0': jnp.ones((C,), jnp.float32),
        'v1': nrm(ks[4], (C, D_MV), 0.1),
        'v2': nrm(ks[5], (D_MV, C), 0.1),
        'g1': nrm(ks[6], (C, D_GATE), 0.1),
        'g2': nrm(ks[7], (D_GATE, C), 0.1),
        'k_k': 0.85 * jnp.ones((C,), jnp.float32),
        'k_a': jnp.ones((C,), jnp.float32),
        'r_k': nrm(ks[8], (H, N), 0.1),
        'Wr': nrm(ks[9], (C, C), C ** -0.5),   # stored (in, out): y = x @ W
        'Wk': nrm(ks[10], (C, C), C ** -0.5),
        'Wv': nrm(ks[11], (C, C), C ** -0.5),
        'Wo': nrm(ks[12], (C, C), C ** -0.5),
        'ln_w': 1.0 + nrm(ks[13], (C,), 0.1),
        'ln_b': nrm(ks[14], (C,), 0.1),
        'time_state': nrm(ks[15], (H, N, N), 0.1),
    }
    return p


# -----------------------------------------------------------------------------
# Full forward of RWKV_Tmix_x070_State (attention_mask=None)
# -----------------------------------------------------------------------------
def rwkv_tmix_x070_state_forward(x, v_first, p, *, n_head, head_size, layer_id, eps,
                                 use_pallas=True):
    B, T, C = x.shape
    H, N = n_head, head_size
    lin = pallas_linear if use_pallas else ref_linear
    lora = pallas_lora if use_pallas else ref_lora

    # time_shift: xx[t] = x[t-1] - x[t], x[-1] = 0  (elementwise prologue left to XLA)
    xx = jnp.concatenate([jnp.zeros((B, 1, C), x.dtype), x[:, :-1, :]], axis=1) - x
    xr = x + xx * p['x_r']
    xw = x + xx * p['x_w']
    xk = x + xx * p['x_k']
    xv = x + xx * p['x_v']
    xa = x + xx * p['x_a']
    xg = x + xx * p['x_g']

    r = lin(xr, p['Wr'])
    w = -jax.nn.softplus(-(p['w0'] + lora(xw, p['w1'], p['w2'], act='tanh'))) - 0.5
    k = lin(xk, p['Wk'])
    v = lin(xv, p['Wv'])

    if layer_id == 0:
        v_first = v
    else:
        v = v + (v_first - v) * jax.nn.sigmoid(p['v0'] + lora(xv, p['v1'], p['v2']))

    a = jax.nn.sigmoid(p['a0'] + lora(xa, p['a1'], p['a2']))
    g = lora(xg, p['g1'], p['g2'], act='sigmoid')

    kk = k * p['k_k']
    kkh = kk.reshape(B, T, H, N)
    kkh = kkh / jnp.maximum(
        jnp.sqrt(jnp.sum(kkh * kkh, axis=-1, keepdims=True)), 1e-12)
    kk = kkh.reshape(B, T, C)
    k = k * (1.0 + (a - 1.0) * p['k_a'])

    # --- RWKV-7 state recurrence (hot path) ---
    if use_pallas:
        # time_state (H, N, N) packed once (tiny parameter) into S0[i, h*N+j].
        s0_packed = jnp.transpose(p['time_state'], (1, 0, 2)).reshape(N, C)
        xo = rwkv7_state_pallas(r, w, k, -kk, kk * a, v, s0_packed,
                                n_head=H, head_size=N)            # (B, T, C)
    else:
        xo = rwkv7_state_ref(r, w, k, -kk, kk * a, v, p['time_state'],
                             n_head=H, head_size=N)               # (B, T, C)
    xo2 = xo.reshape(B * T, C)

    # --- GroupNorm(H, C) + per-head bonus + gating (fused in Pallas path) ---
    if use_pallas:
        y = pallas_gn_epilogue(xo2, r.reshape(B * T, C), k.reshape(B * T, C),
                               v.reshape(B * T, C), g.reshape(B * T, C),
                               p['ln_w'], p['ln_b'], p['r_k'], n_head=H, eps=eps)
    else:
        y = ref_groupnorm(xo2, p['ln_w'], p['ln_b'], H, eps)
        rh = r.reshape(B * T, H, N)
        kh = k.reshape(B * T, H, N)
        vh = v.reshape(B * T, H, N)
        bonus = (jnp.sum(rh * kh * p['r_k'], axis=-1, keepdims=True) * vh).reshape(B * T, C)
        y = (y + bonus) * g.reshape(B * T, C)

    out = lin(y.reshape(B, T, C), p['Wo'])
    return out, v_first


# -----------------------------------------------------------------------------
if __name__ == "__main__":
    C = 64          # n_embd / dim_att
    HEAD_SIZE = 16  # head_size_a
    H, N = C // HEAD_SIZE, HEAD_SIZE
    B, T = 2, 384   # T -> 3 chunks of 128 so the state carry across chunks is exercised
    n_layer, layer_id = 2, 1          # layer_id != 0 -> v-residual LoRA path active
    head_size_divisor = 8
    eps = 1e-5 * head_size_divisor ** 2

    key = jax.random.PRNGKey(0)
    kp, kx, kv = jax.random.split(key, 3)
    params = init_params(kp, C, H, N, layer_id, n_layer)
    x = jax.random.normal(kx, (B, T, C), dtype=jnp.float32)
    v_first = jax.random.normal(kv, (B, T, C), dtype=jnp.float32)

    fwd = functools.partial(rwkv_tmix_x070_state_forward,
                            n_head=H, head_size=N, layer_id=layer_id, eps=eps)

    out, vf = fwd(x, v_first, params, use_pallas=True)
    out = jax.block_until_ready(out)

    out_ref, _ = fwd(x, v_first, params, use_pallas=False)
    out_ref = jax.block_until_ready(out_ref)

    assert out.shape == (B, T, C) and vf.shape == (B, T, C)
    if not jnp.allclose(out, out_ref, atol=5e-3, rtol=5e-3):
        raise AssertionError(
            f"Pallas/reference mismatch, max_err={float(jnp.max(jnp.abs(out - out_ref)))}")
    print("KERNEL_OK")
</pallas_src>

<mosaic_0001>
module attributes {stable_mosaic.version = 11 : i64} {
  func.func @_matmul_kernel(%arg0: i32, %arg1: i32, %arg2: i32, %arg3: memref<256x64xf32, #tpu.memory_space<vmem>>, %arg4: memref<64x64xf32, #tpu.memory_space<vmem>>, %arg5: memref<256x64xf32, #tpu.memory_space<vmem>>, %arg6: memref<256x64xf32, #tpu.memory_space<vmem>>) attributes {dimension_semantics = [#tpu.dimension_semantics<parallel>, #tpu.dimension_semantics<parallel>, #tpu.dimension_semantics<arbitrary>], iteration_bounds = array<i64: 3, 1, 1>, scalar_prefetch = 0 : i64, scratch_operands = 1 : i64, tpu.core_type = #tpu.core_type<tc>, window_params = [{transform_indices = @transform_0, window_bounds = array<i64: 256, 64>}, {transform_indices = @transform_1, window_bounds = array<i64: 64, 64>}, {transform_indices = @transform_2, window_bounds = array<i64: 256, 64>}]} {
    %c0_i32 = arith.constant 0 : i32
    %0 = arith.cmpi eq, %arg2, %c0_i32 : i32
    %1 = arith.extui %0 : i1 to i32
    %c0_i32_0 = arith.constant 0 : i32
    %2 = arith.cmpi ne, %1, %c0_i32_0 : i32
    scf.if %2 {
      %cst_10 = arith.constant 0.000000e+00 : f32
      %14 = vector.broadcast %cst_10 : f32 to vector<256x64xf32>
      %c0_11 = arith.constant 0 : index
      %c0_12 = arith.constant 0 : index
      %15 = vector.load %arg6[%c0_11, %c0_12] : memref<256x64xf32, #tpu.memory_space<vmem>>, vector<256x64xf32>
      tpu.vector_store %arg6[%c0_11, %c0_12], %14 {strides = array<i32>} : memref<256x64xf32, #tpu.memory_space<vmem>>, vector<256x64xf32>,
    } else {
    }
    %c0 = arith.constant 0 : index
    %c0_1 = arith.constant 0 : index
    %3 = vector.load %arg6[%c0, %c0_1] : memref<256x64xf32, #tpu.memory_space<vmem>>, vector<256x64xf32>
    %c0_2 = arith.constant 0 : index
    %c0_3 = arith.constant 0 : index
    %4 = vector.load %arg3[%c0_2, %c0_3] : memref<256x64xf32, #tpu.memory_space<vmem>>, vector<256x64xf32>
    %5 = arith.truncf %4 : vector<256x64xf32> to vector<256x64xbf16>
    %c0_4 = arith.constant 0 : index
    %c0_5 = arith.constant 0 : index
    %6 = vector.load %arg4[%c0_4, %c0_5] : memref<64x64xf32, #tpu.memory_space<vmem>>, vector<64x64xf32>
    %7 = arith.truncf %6 : vector<64x64xf32> to vector<64x64xbf16>
    %cst = arith.constant dense<0.000000e+00> : vector<256x64xf32>
    %8 = tpu.matmul %5, %7, %cst {dimension_numbers = #tpu.dot_dimension_numbers<[1], [0], [0], [1], [0, 0, 1, 1], [], []>} : vector<256x64xbf16>, vector<64x64xbf16>, vector<256x64xf32> -> vector<256x64xf32>
    %9 = arith.addf %3, %8 : vector<256x64xf32>
    %c0_6 = arith.constant 0 : index
    %c0_7 = arith.constant 0 : index
    %10 = vector.load %arg6[%c0_6, %c0_7] : memref<256x64xf32, #tpu.memory_space<vmem>>, vector<256x64xf32>
    tpu.vector_store %arg6[%c0_6, %c0_7], %9 {strides = array<i32>} : memref<256x64xf32, #tpu.memory_space<vmem>>, vector<256x64xf32>,
    %c0_i32_8 = arith.constant 0 : i32
    %11 = arith.cmpi eq, %arg2, %c0_i32_8 : i32
    %12 = arith.extui %11 : i1 to i32
    %c0_i32_9 = arith.constant 0 : i32
    %13 = arith.cmpi ne, %12, %c0_i32_9 : i32
    scf.if %13 {
      %c0_10 = arith.constant 0 : index
      %c0_11 = arith.constant 0 : index
      %14 = vector.load %arg6[%c0_10, %c0_11] : memref<256x64xf32, #tpu.memory_space<vmem>>, vector<256x64xf32>
      %c0_12 = arith.constant 0 : index
      %c0_13 = arith.constant 0 : index
      %15 = vector.load %arg5[%c0_12, %c0_13] : memref<256x64xf32, #tpu.memory_space<vmem>>, vector<256x64xf32>
      tpu.vector_store %arg5[%c0_12, %c0_13], %14 {strides = array<i32>} : memref<256x64xf32, #tpu.memory_space<vmem>>, vector<256x64xf32>,
    } else {
    }
    return
  }
  func.func @transform_0(%arg0: i32, %arg1: i32, %arg2: i32) -> (i32, i32) {
    %c0_i32 = arith.constant 0 : i32
    return %arg0, %arg2 : i32, i32
  }
  func.func @transform_1(%arg0: i32, %arg1: i32, %arg2: i32) -> (i32, i32) {
    %c0_i32 = arith.constant 0 : i32
    return %arg2, %arg1 : i32, i32
  }
  func.func @transform_2(%arg0: i32, %arg1: i32, %arg2: i32) -> (i32, i32) {
    %c0_i32 = arith.constant 0 : i32
    return %arg0, %arg1 : i32, i32
  }
}

</mosaic_0001>

<bundles_post_ra>
// kernel: tpu_custom_call.1
= control target key start
LH: loop header
LB: loop body
LE: loop exit
PB: predicated region body
PF: predicated region fallthrough
CT: control target
= control target key end

     0   :  { %s821_s9 = smov 0   ;;  %s823_s10 = smov 0   ;;  %s1097_s0 = inlined_call_operand.vmem [shape: f32[768,64], index: 0, kind: input, shape index: {}]   ;;  %s1098_s1 = inlined_call_operand.vmem [shape: f32[64,64], index: 1, kind: input, shape index: {}]   ;;  %s1099_s2 = inlined_call_operand.vmem [shape: f32[768,64], index: 2, kind: output, shape index: {}]  }
   0x1   :  { %s825_s11 = smov 0  }
   0x2 LB: > { %s31_s12 = sadd.s32 1, %s799_s10  ;;  %p721_p0 = scmp.ge.s32.totalorder %s803_s11, 1  ;;  %s803_s11 = sphi %s825_s11, %s12_s11   ;;  %s799_s10 = sphi %s823_s10, %s1101_s10   ;;  %s795_s9 = sphi %s821_s9, %s1100_s9  }
   0x3   : > { %p33_p1 = scmp.ge.s32.totalorder %s31_s12, 3  ;;  %p155_p2 = scmp.lt.s32.totalorder %s803_s11, 4 }
   0x5   : > { %s1103_s12 = smov (%p33_p1, %s31_s12), 0  ;;  %p156_p3 = pnand %p721_p0, %p155_p2 }
   0x6   : > { %s722_s19 = sshll.u32 (!%p156_p3), %s795_s9, 5 }
   0x7   : > { %159 = sbr.rel (%p156_p3) target bundleno = 232 (0xe8), region = 28  ;;  %p192_p4 = scmp.lt.s32.totalorder (!%p156_p3), %s722_s19, 95 }
   0xc   : > { %v342_v0 = vld [vmem:[%s1098_s1 + $0x30] sm:$0xff]  ;;  %v343_v1 = vld [vmem:[%s1098_s1 + $0x38] sm:$0xff]  ;;  %v340_v2 = vld [vmem:[%s1098_s1 + $0x20] sm:$0xff]  ;;  %s1105_s19 = smov (!%p192_p4, %s722_s19), 95  ;;  %vm223_vm0 = vcmask 523264   ;;  %v805_v36 = vmov 0.0  }
   0xd   : > { %v347_v3 = vpack.c.bf16 %v343_v1, %v342_v0  ;;  %v341_v4 = vld [vmem:[%s1098_s1 + $0x28] sm:$0xff]  ;;  %v338_v6 = vld [vmem:[%s1098_s1 + $0x10] sm:$0xff]  ;;  %v339_v7 = vld [vmem:[%s1098_s1 + $0x18] sm:$0xff]  ;;  %s723_s26 = sshll.u32 %s1105_s19, 3  ;;  %224 = vst.msk [vmem:[#allocation2] sm:$0xff] %vm223_vm0, %v805_v36 }
   0xe   : > { %v346_v5 = vpack.c.bf16 %v341_v4, %v340_v2  ;;  %v345_v8 = vpack.c.bf16 %v339_v7, %v338_v6  ;;  %s865_s29 = scalar_lea.vmem %s1097_s0, %s723_s26  ;;  %v336_v9 = vld [vmem:[%s1098_s1] sm:$0xff]  ;;  %v337_v10 = vld [vmem:[%s1098_s1 + $0x8] sm:$0xff]  ;;  %225 = vst.msk [vmem:[#allocation2 + $0x8] sm:$0xff] %vm223_vm0, %v805_v36  ;;  %s992_s8 = scalar_lea.vmem %s1099_s2, %s723_s26 }
   0xf   : > { %401 = vmatpush.bf16.msra.mxu0 %v347_v3  ;;  %744 = vmatpush.bf16.msra.mxu1 %v347_v3  ;;  %v288_v11 = vld [vmem:[%s865_s29] sm:$0xff]  ;;  %v289_v12 = vld [vmem:[%s865_s29 + $0x8] sm:$0xff]  ;;  %v344_v13 = vpack.c.bf16 %v337_v10, %v336_v9  ;;  %v290_v24 = vld [vmem:[%s865_s29 + $0x10] sm:$0xff]  ;;  %226 = vst.msk [vmem:[#allocation2 + $0x10] sm:$0xff] %vm223_vm0, %v805_v36 }
  0x10   : > { %745 = vmatpush.bf16.msra.mxu2 %v347_v3  ;;  %746 = vmatpush.bf16.msra.mxu3 %v347_v3  ;;  %v296_v14 = vld [vmem:[%s865_s29 + $0x40] sm:$0xff]  ;;  %v297_v15 = vld [vmem:[%s865_s29 + $0x48] sm:$0xff]  ;;  %v320_v20 = vpack.c.bf16 %v289_v12, %v288_v11  ;;  %v291_v25 = vld [vmem:[%s865_s29 + $0x18] sm:$0xff]  ;;  %227 = vst.msk [vmem:[#allocation2 + $0x18] sm:$0xff] %vm223_vm0, %v805_v36 }
  0x11   : > { %v304_v16 = vld [vmem:[%s865_s29 + $0x80] sm:$0xff]  ;;  %v305_v17 = vld [vmem:[%s865_s29 + $0x88] sm:$0xff]  ;;  %v324_v21 = vpack.c.bf16 %v297_v15, %v296_v14  ;;  %v298_v26 = vld [vmem:[%s865_s29 + $0x50] sm:$0xff]  ;;  %v321_v32 = vpack.c.bf16 %v291_v25, %v290_v24  ;;  %228 = vst.msk [vmem:[#allocation2 + $0x20] sm:$0xff] %vm223_vm0, %v805_v36 }
  0x12   : > { %v312_v18 = vld [vmem:[%s865_s29 + $0xc0] sm:$0xff]  ;;  %v313_v19 = vld [vmem:[%s865_s29 + $0xc8] sm:$0xff]  ;;  %v328_v22 = vpack.c.bf16 %v305_v17, %v304_v16  ;;  %v299_v27 = vld [vmem:[%s865_s29 + $0x58] sm:$0xff]  ;;  %229 = vst.msk [vmem:[#allocation2 + $0x28] sm:$0xff] %vm223_vm0, %v805_v36 }
  0x13   : > { %402 = vmatpush.bf16.msra.mxu0 %v346_v5  ;;  %747 = vmatpush.bf16.msra.mxu1 %v346_v5  ;;  %v332_v23 = vpack.c.bf16 %v313_v19, %v312_v18  ;;  %v306_v28 = vld [vmem:[%s865_s29 + $0x90] sm:$0xff]  ;;  %v307_v29 = vld [vmem:[%s865_s29 + $0x98] sm:$0xff]  ;;  %v325_v33 = vpack.c.bf16 %v299_v27, %v298_v26  ;;  %v292_v37 = vld [vmem:[%s865_s29 + $0x20] sm:$0xff]  ;;  %230 = vst.msk [vmem:[#allocation2 + $0x30] sm:$0xff] %vm223_vm0, %v805_v36 }
  0x14   : > { %748 = vmatpush.bf16.msra.mxu2 %v346_v5  ;;  %749 = vmatpush.bf16.msra.mxu3 %v346_v5  ;;  %v314_v30 = vld [vmem:[%s865_s29 + $0xd0] sm:$0xff]  ;;  %v315_v31 = vld [vmem:[%s865_s29 + $0xd8] sm:$0xff]  ;;  %v329_v34 = vpack.c.bf16 %v307_v29, %v306_v28  ;;  %v293_v38 = vld [vmem:[%s865_s29 + $0x28] sm:$0xff]  ;;  %231 = vst.msk [vmem:[#allocation2 + $0x38] sm:$0xff] %vm223_vm0, %v805_v36 }
  0x15   : > { %v333_v35 = vpack.c.bf16 %v315_v31, %v314_v30  ;;  %v300_v39 = vld [vmem:[%s865_s29 + $0x60] sm:$0xff]  ;;  %v301_v40 = vld [vmem:[%s865_s29 + $0x68] sm:$0xff]  ;;  %232 = vst.msk [vmem:[#allocation2 + $0x40] sm:$0xff] %vm223_vm0, %v805_v36  ;;  %v322_v45 = vpack.c.bf16 %v293_v38, %v292_v37  ;;  %v294_v49 = vld [vmem:[%s865_s29 + $0x30] sm:$0xff] }
  0x16   : > { %v308_v41 = vld [vmem:[%s865_s29 + $0xa0] sm:$0xff]  ;;  %v309_v42 = vld [vmem:[%s865_s29 + $0xa8] sm:$0xff]  ;;  %233 = vst.msk [vmem:[#allocation2 + $0x48] sm:$0xff] %vm223_vm0, %v805_v36  ;;  %v326_v46 = vpack.c.bf16 %v301_v40, %v300_v39  ;;  %v295_v50 = vld [vmem:[%s865_s29 + $0x38] sm:$0xff] }
  0x17   : > { %403 = vmatpush.bf16.msra.mxu0 %v345_v8  ;;  %750 = vmatpush.bf16.msra.mxu1 %v345_v8  ;;  %v316_v43 = vld [vmem:[%s865_s29 + $0xe0] sm:$0xff]  ;;  %v317_v44 = vld [vmem:[%s865_s29 + $0xe8] sm:$0xff]  ;;  %234 = vst.msk [vmem:[#allocation2 + $0x50] sm:$0xff] %vm223_vm0, %v805_v36  ;;  %v330_v47 = vpack.c.bf16 %v309_v42, %v308_v41  ;;  %v302_v51 = vld [vmem:[%s865_s29 + $0x70] sm:$0xff]  ;;  %v323_v57 = vpack.c.bf16 %v295_v50, %v294_v49 }
  0x18   : > { %751 = vmatpush.bf16.msra.mxu2 %v345_v8  ;;  %752 = vmatpush.bf16.msra.mxu3 %v345_v8  ;;  %v334_v48 = vpack.c.bf16 %v317_v44, %v316_v43  ;;  %235 = vst.msk [vmem:[#allocation2 + $0x58] sm:$0xff] %vm223_vm0, %v805_v36  ;;  %v303_v52 = vld [vmem:[%s865_s29 + $0x78] sm:$0xff]  ;;  %v310_v53 = vld [vmem:[%s865_s29 + $0xb0] sm:$0xff]  ;;  %v256_v61 = vld [vmem:[#allocation2] sm:$0xff] }
  0x19   : > { %236 = vst.msk [vmem:[#allocation2 + $0x60] sm:$0xff] %vm223_vm0, %v805_v36  ;;  %v311_v54 = vld [vmem:[%s865_s29 + $0xb8] sm:$0xff]  ;;  %v318_v55 = vld [vmem:[%s865_s29 + $0xf0] sm:$0xff]  ;;  %v327_v58 = vpack.c.bf16 %v303_v52, %v302_v51  ;;  %v257_v7 = vld [vmem:[#allocation2 + $0x8] sm:$0xff] }
  0x1a   : > { %237 = vst.msk [vmem:[#allocation2 + $0x68] sm:$0xff] %vm223_vm0, %v805_v36  ;;  %v319_v56 = vld [vmem:[%s865_s29 + $0xf8] sm:$0xff]  ;;  %v331_v59 = vpack.c.bf16 %v311_v54, %v310_v53  ;;  %v258_v26 = vld [vmem:[#allocation2 + $0x10] sm:$0xff] }
  0x1b   : > { %404 = vmatpush.bf16.msra.mxu0 %v344_v13  ;;  %753 = vmatpush.bf16.msra.mxu1 %v344_v13  ;;  %238 = vst.msk [vmem:[#allocation2 + $0x70] sm:$0xff] %vm223_vm0, %v805_v36  ;;  %v335_v60 = vpack.c.bf16 %v319_v56, %v318_v55  ;;  %v259_v37 = vld [vmem:[#allocation2 + $0x18] sm:$0xff] }
  0x1c   : > { %754 = vmatpush.bf16.msra.mxu2 %v344_v13  ;;  %755 = vmatpush.bf16.msra.mxu3 %v344_v13  ;;  %239 = vst.msk [vmem:[#allocation2 + $0x78] sm:$0xff] %vm223_vm0, %v805_v36  ;;  %v264_v62 = vld [vmem:[#allocation2 + $0x40] sm:$0xff] }
  0x1d   : > { %240 = vst.msk [vmem:[#allocation2 + $0x80] sm:$0xff] %vm223_vm0, %v805_v36  ;;  %v265_v10 = vld [vmem:[#allocation2 + $0x48] sm:$0xff] }
  0x1e   : > { %726 = vmatmul.msk.bf16.vlgmr.msra.gmra.mxu0 %vm223_vm0, %v320_v20  ;;  %730 = vmatmul.msk.bf16.vlgmr.msra.gmra.mxu1 %vm223_vm0, %v324_v21  ;;  %241 = vst.msk [vmem:[#allocation2 + $0x88] sm:$0xff] %vm223_vm0, %v805_v36  ;;  %v266_v27 = vld [vmem:[#allocation2 + $0x50] sm:$0xff] }
  0x1f   : > { %734 = vmatmul.msk.bf16.vlgmr.msra.gmra.mxu2 %vm223_vm0, %v328_v22  ;;  %738 = vmatmul.msk.bf16.vlgmr.msra.gmra.mxu3 %vm223_vm0, %v332_v23  ;;  %242 = vst.msk [vmem:[#allocation2 + $0x90] sm:$0xff] %vm223_vm0, %v805_v36  ;;  %v267_v40 = vld [vmem:[#allocation2 + $0x58] sm:$0xff] }
  0x20   : > { %243 = vst.msk [vmem:[#allocation2 + $0x98] sm:$0xff] %vm223_vm0, %v805_v36 }
  0x21   : > { %244 = vst.msk [vmem:[#allocation2 + $0xa0] sm:$0xff] %vm223_vm0, %v805_v36 }
  0x22   : > { %245 = vst.msk [vmem:[#allocation2 + $0xa8] sm:$0xff] %vm223_vm0, %v805_v36 }
  0x23   : > { %246 = vst.msk [vmem:[#allocation2 + $0xb0] sm:$0xff] %vm223_vm0, %v805_v36 }
  0x24   : > { %247 = vst.msk [vmem:[#allocation2 + $0xb8] sm:$0xff] %vm223_vm0, %v805_v36  ;;  %v272_v3 = vld [vmem:[#allocation2 + $0x80] sm:$0xff] }
  0x25   : > { %248 = vst.msk [vmem:[#allocation2 + $0xc0] sm:$0xff] %vm223_vm0, %v805_v36  ;;  %v273_v17 = vld [vmem:[#allocation2 + $0x88] sm:$0xff] }
  0x26   : > { %249 = vst.msk [vmem:[#allocation2 + $0xc8] sm:$0xff] %vm223_vm0, %v805_v36 }
  0x27   : > { %250 = vst.msk [vmem:[#allocation2 + $0xd0] sm:$0xff] %vm223_vm0, %v805_v36 }
  0x28   : > { %251 = vst.msk [vmem:[#allocation2 + $0xd8] sm:$0xff] %vm223_vm0, %v805_v36 }
  0x29   : > { %252 = vst.msk [vmem:[#allocation2 + $0xe0] sm:$0xff] %vm223_vm0, %v805_v36 }
  0x2a   : > { %253 = vst.msk [vmem:[#allocation2 + $0xe8] sm:$0xff] %vm223_vm0, %v805_v36 }
  0x2b   : > { %254 = vst.msk [vmem:[#allocation2 + $0xf0] sm:$0xff] %vm223_vm0, %v805_v36 }
  0x2c   : > { %255 = vst.msk [vmem:[#allocation2 + $0xf8] sm:$0xff] %vm223_vm0, %v805_v36  ;;  %v280_v4 = vld [vmem:[#allocation2 + $0xc0] sm:$0xff] }
  0x2d   : > { %v281_v18 = vld [vmem:[#allocation2 + $0xc8] sm:$0xff] }
  0x2e   : > { %727 = vmatmul.msk.bf16.gmra.mxu0 %vm223_vm0, %v321_v32  ;;  %731 = vmatmul.msk.bf16.gmra.mxu1 %vm223_vm0, %v325_v33  ;;  %v274_v32 = vld [vmem:[#allocation2 + $0x90] sm:$0xff] }
  0x2f   : > { %735 = vmatmul.msk.bf16.gmra.mxu2 %vm223_vm0, %v329_v34  ;;  %739 = vmatmul.msk.bf16.gmra.mxu3 %vm223_vm0, %v333_v35  ;;  %v282_v34 = vld [vmem:[#allocation2 + $0xd0] sm:$0xff] }
  0x3e   : > { %728 = vmatmul.msk.bf16.gmra.mxu0 %vm223_vm0, %v322_v45  ;;  %732 = vmatmul.msk.bf16.gmra.mxu1 %vm223_vm0, %v326_v46 }
  0x3f   : > { %736 = vmatmul.msk.bf16.gmra.mxu2 %vm223_vm0, %v330_v47  ;;  %740 = vmatmul.msk.bf16.gmra.mxu3 %vm223_vm0, %v334_v48  ;;  %v275_v47 = vld [vmem:[#allocation2 + $0x98] sm:$0xff] }
  0x40   : > { %v283_v48 = vld [vmem:[#allocation2 + $0xd8] sm:$0xff] }
  0x4e   : > { %729 = vmatmul.msk.bf16.gmra.mxu0 %vm223_vm0, %v323_v57  ;;  %733 = vmatmul.msk.bf16.gmra.mxu1 %vm223_vm0, %v327_v58  ;;  %v260_v58 = vld [vmem:[#allocation2 + $0x20] sm:$0xff] }
  0x4f   : > { %737 = vmatmul.msk.bf16.gmra.mxu2 %vm223_vm0, %v331_v59  ;;  %741 = vmatmul.msk.bf16.gmra.mxu3 %vm223_vm0, %v335_v60  ;;  %v268_v59 = vld [vmem:[#allocation2 + $0x60] sm:$0xff] }
  0x9b   : > { %v406_v63 = vpop.f32.mrf.mxu0  ;;  %v426_v0 = vpop.f32.mrf.mxu1 }
  0x9c   : > { %v486_v1 = vadd.f32 %v406_v63, %v256_v61  ;;  %v494_v2 = vadd.f32 %v426_v0, %v264_v62  ;;  %v276_v0 = vld [vmem:[#allocation2 + $0xa0] sm:$0xff] }
  0x9e   : > { %518 = vst.msk [vmem:[#allocation2] sm:$0xff] %vm223_vm0, %v486_v1 }
  0x9f   : > { %526 = vst.msk [vmem:[#allocation2 + $0x40] sm:$0xff] %vm223_vm0, %v494_v2  ;;  %v284_v2 = vld [vmem:[#allocation2 + $0xe0] sm:$0xff] }
  0xa2   : > { %v446_v5 = vpop.f32.mrf.mxu2  ;;  %v466_v6 = vpop.f32.mrf.mxu3 }
  0xa3   : > { %v502_v8 = vadd.f32 %v446_v5, %v272_v3  ;;  %v408_v9 = vpop.f32.mrf.mxu0  ;;  %v428_v11 = vpop.f32.mrf.mxu1  ;;  %v510_v12 = vadd.f32 %v466_v6, %v280_v4  ;;  %v261_v5 = vld [vmem:[#allocation2 + $0x28] sm:$0xff] }
  0xa4   : > { %v487_v14 = vadd.f32 %v408_v9, %v257_v7  ;;  %v495_v16 = vadd.f32 %v428_v11, %v265_v10 }
  0xa5   : > { %v553_v13 = vld [vmem:[#allocation2] sm:$0xff]  ;;  %534 = vst.msk [vmem:[#allocation2 + $0x80] sm:$0xff] %vm223_vm0, %v502_v8  ;;  %v269_v8 = vld [vmem:[#allocation2 + $0x68] sm:$0xff] }
  0xa6   : > { %585 = vst.msk [vmem:[%s992_s8] sm:$0xff] %vm223_vm0, %v553_v13  ;;  %v561_v15 = vld [vmem:[#allocation2 + $0x40] sm:$0xff] }
  0xa7   : > { %593 = vst.msk [vmem:[%s992_s8 + $0x40] sm:$0xff] %vm223_vm0, %v561_v15  ;;  %v277_v15 = vld [vmem:[#allocation2 + $0xa8] sm:$0xff] }
  0xa8   : > { %542 = vst.msk [vmem:[#allocation2 + $0xc0] sm:$0xff] %vm223_vm0, %v510_v12 }
  0xa9   : > { %519 = vst.msk [vmem:[#allocation2 + $0x8] sm:$0xff] %vm223_vm0, %v487_v14 }
  0xaa   : > { %527 = vst.msk [vmem:[#allocation2 + $0x48] sm:$0xff] %vm223_vm0, %v495_v16  ;;  %v448_v19 = vpop.f32.mrf.mxu2  ;;  %v468_v20 = vpop.f32.mrf.mxu3  ;;  %v285_v16 = vld [vmem:[#allocation2 + $0xe8] sm:$0xff] }
  0xab   : > { %v503_v21 = vadd.f32 %v448_v19, %v273_v17  ;;  %v511_v22 = vadd.f32 %v468_v20, %v281_v18  ;;  %v411_v23 = vpop.f32.mrf.mxu0  ;;  %v431_v24 = vpop.f32.mrf.mxu1 }
  0xac   : > { %v569_v25 = vld [vmem:[#allocation2 + $0x80] sm:$0xff]  ;;  %v488_v29 = vadd.f32 %v411_v23, %v258_v26  ;;  %v496_v31 = vadd.f32 %v431_v24, %v266_v27  ;;  %v262_v26 = vld [vmem:[#allocation2 + $0x30] sm:$0xff] }
  0xad   : > { %601 = vst.msk [vmem:[%s992_s8 + $0x80] sm:$0xff] %vm223_vm0, %v569_v25  ;;  %v270_v27 = vld [vmem:[#allocation2 + $0x70] sm:$0xff] }
  0xae   : > { %535 = vst.msk [vmem:[#allocation2 + $0x88] sm:$0xff] %vm223_vm0, %v503_v21 }
  0xaf   : > { %v577_v28 = vld [vmem:[#allocation2 + $0xc0] sm:$0xff]  ;;  %543 = vst.msk [vmem:[#allocation2 + $0xc8] sm:$0xff] %vm223_vm0, %v511_v22 }
  0xb0   : > { %609 = vst.msk [vmem:[%s992_s8 + $0xc0] sm:$0xff] %vm223_vm0, %v577_v28  ;;  %v554_v30 = vld [vmem:[#allocation2 + $0x8] sm:$0xff] }
  0xb1   : > { %586 = vst.msk [vmem:[%s992_s8 + $0x8] sm:$0xff] %vm223_vm0, %v554_v30  ;;  %v562_v33 = vld [vmem:[#allocation2 + $0x48] sm:$0xff] }
  0xb2   : > { %594 = vst.msk [vmem:[%s992_s8 + $0x48] sm:$0xff] %vm223_vm0, %v562_v33  ;;  %v451_v35 = vpop.f32.mrf.mxu2  ;;  %v471_v36 = vpop.f32.mrf.mxu3 }
  0xb3   : > { %520 = vst.msk [vmem:[#allocation2 + $0x10] sm:$0xff] %vm223_vm0, %v488_v29  ;;  %v504_v38 = vadd.f32 %v451_v35, %v274_v32  ;;  %v413_v39 = vpop.f32.mrf.mxu0  ;;  %v433_v41 = vpop.f32.mrf.mxu1  ;;  %v512_v42 = vadd.f32 %v471_v36, %v282_v34  ;;  %v278_v32 = vld [vmem:[#allocation2 + $0xb0] sm:$0xff] }
  0xb4   : > { %528 = vst.msk [vmem:[#allocation2 + $0x50] sm:$0xff] %vm223_vm0, %v496_v31  ;;  %v489_v44 = vadd.f32 %v413_v39, %v259_v37  ;;  %v497_v46 = vadd.f32 %v433_v41, %v267_v40  ;;  %v286_v34 = vld [vmem:[#allocation2 + $0xf0] sm:$0xff]  ;;  %v263_v37 = vld [vmem:[#allocation2 + $0x38] sm:$0xff] }
  0xb5   : > { %v570_v43 = vld [vmem:[#allocation2 + $0x88] sm:$0xff]  ;;  %536 = vst.msk [vmem:[#allocation2 + $0x90] sm:$0xff] %vm223_vm0, %v504_v38  ;;  %v271_v40 = vld [vmem:[#allocation2 + $0x78] sm:$0xff] }
  0xb6   : > { %602 = vst.msk [vmem:[%s992_s8 + $0x88] sm:$0xff] %vm223_vm0, %v570_v43  ;;  %v578_v45 = vld [vmem:[#allocation2 + $0xc8] sm:$0xff] }
  0xb7   : > { %610 = vst.msk [vmem:[%s992_s8 + $0xc8] sm:$0xff] %vm223_vm0, %v578_v45 }
  0xb8   : > { %544 = vst.msk [vmem:[#allocation2 + $0xd0] sm:$0xff] %vm223_vm0, %v512_v42 }
  0xb9   : > { %521 = vst.msk [vmem:[#allocation2 + $0x18] sm:$0xff] %vm223_vm0, %v489_v44 }
  0xba   : > { %v555_v49 = vld [vmem:[#allocation2 + $0x10] sm:$0xff]  ;;  %529 = vst.msk [vmem:[#allocation2 + $0x58] sm:$0xff] %vm223_vm0, %v497_v46  ;;  %v453_v50 = vpop.f32.mrf.mxu2  ;;  %v473_v51 = vpop.f32.mrf.mxu3 }
  0xbb   : > { %587 = vst.msk [vmem:[%s992_s8 + $0x10] sm:$0xff] %vm223_vm0, %v555_v49  ;;  %v563_v52 = vld [vmem:[#allocation2 + $0x50] sm:$0xff]  ;;  %v505_v53 = vadd.f32 %v453_v50, %v275_v47  ;;  %v513_v54 = vadd.f32 %v473_v51, %v283_v48  ;;  %v416_v55 = vpop.f32.mrf.mxu0  ;;  %v436_v56 = vpop.f32.mrf.mxu1  ;;  %v279_v47 = vld [vmem:[#allocation2 + $0xb8] sm:$0xff] }
  0xbc   : > { %595 = vst.msk [vmem:[%s992_s8 + $0x50] sm:$0xff] %vm223_vm0, %v563_v52  ;;  %v571_v57 = vld [vmem:[#allocation2 + $0x90] sm:$0xff]  ;;  %v490_v61 = vadd.f32 %v416_v55, %v260_v58  ;;  %v498_v63 = vadd.f32 %v436_v56, %v268_v59  ;;  %v287_v48 = vld [vmem:[#allocation2 + $0xf8] sm:$0xff] }
  0xbd   : > { %603 = vst.msk [vmem:[%s992_s8 + $0x90] sm:$0xff] %vm223_vm0, %v571_v57 }
  0xbe   : > { %537 = vst.msk [vmem:[#allocation2 + $0x98] sm:$0xff] %vm223_vm0, %v505_v53 }
  0xbf   : > { %v579_v60 = vld [vmem:[#allocation2 + $0xd0] sm:$0xff]  ;;  %545 = vst.msk [vmem:[#allocation2 + $0xd8] sm:$0xff] %vm223_vm0, %v513_v54 }
  0xc0   : > { %611 = vst.msk [vmem:[%s992_s8 + $0xd0] sm:$0xff] %vm223_vm0, %v579_v60  ;;  %v556_v62 = vld [vmem:[#allocation2 + $0x18] sm:$0xff] }
  0xc1   : > { %588 = vst.msk [vmem:[%s992_s8 + $0x18] sm:$0xff] %vm223_vm0, %v556_v62  ;;  %v564_v1 = vld [vmem:[#allocation2 + $0x58] sm:$0xff] }
  0xc2   : > { %596 = vst.msk [vmem:[%s992_s8 + $0x58] sm:$0xff] %vm223_vm0, %v564_v1  ;;  %v456_v3 = vpop.f32.mrf.mxu2  ;;  %v476_v4 = vpop.f32.mrf.mxu3 }
  0xc3   : > { %522 = vst.msk [vmem:[#allocation2 + $0x20] sm:$0xff] %vm223_vm0, %v490_v61  ;;  %v506_v6 = vadd.f32 %v456_v3, %v276_v0  ;;  %v418_v7 = vpop.f32.mrf.mxu0  ;;  %v438_v9 = vpop.f32.mrf.mxu1  ;;  %v514_v10 = vadd.f32 %v476_v4, %v284_v2 }
  0xc4   : > { %530 = vst.msk [vmem:[#allocation2 + $0x60] sm:$0xff] %vm223_vm0, %v498_v63  ;;  %v491_v12 = vadd.f32 %v418_v7, %v261_v5  ;;  %v499_v14 = vadd.f32 %v438_v9, %v269_v8 }
  0xc5   : > { %v572_v11 = vld [vmem:[#allocation2 + $0x98] sm:$0xff]  ;;  %538 = vst.msk [vmem:[#allocation2 + $0xa0] sm:$0xff] %vm223_vm0, %v506_v6 }
  0xc6   : > { %604 = vst.msk [vmem:[%s992_s8 + $0x98] sm:$0xff] %vm223_vm0, %v572_v11  ;;  %v580_v13 = vld [vmem:[#allocation2 + $0xd8] sm:$0xff] }
  0xc7   : > { %612 = vst.msk [vmem:[%s992_s8 + $0xd8] sm:$0xff] %vm223_vm0, %v580_v13 }
  0xc8   : > { %546 = vst.msk [vmem:[#allocation2 + $0xe0] sm:$0xff] %vm223_vm0, %v514_v10 }
  0xc9   : > { %523 = vst.msk [vmem:[#allocation2 + $0x28] sm:$0xff] %vm223_vm0, %v491_v12 }
  0xca   : > { %v557_v17 = vld [vmem:[#allocation2 + $0x20] sm:$0xff]  ;;  %531 = vst.msk [vmem:[#allocation2 + $0x68] sm:$0xff] %vm223_vm0, %v499_v14  ;;  %v458_v18 = vpop.f32.mrf.mxu2  ;;  %v478_v19 = vpop.f32.mrf.mxu3 }
  0xcb   : > { %589 = vst.msk [vmem:[%s992_s8 + $0x20] sm:$0xff] %vm223_vm0, %v557_v17  ;;  %v565_v20 = vld [vmem:[#allocation2 + $0x60] sm:$0xff]  ;;  %v507_v21 = vadd.f32 %v458_v18, %v277_v15  ;;  %v515_v22 = vadd.f32 %v478_v19, %v285_v16  ;;  %v421_v23 = vpop.f32.mrf.mxu0  ;;  %v441_v24 = vpop.f32.mrf.mxu1 }
  0xcc   : > { %597 = vst.msk [vmem:[%s992_s8 + $0x60] sm:$0xff] %vm223_vm0, %v565_v20  ;;  %v573_v25 = vld [vmem:[#allocation2 + $0xa0] sm:$0xff]  ;;  %v492_v29 = vadd.f32 %v421_v23, %v262_v26  ;;  %v500_v31 = vadd.f32 %v441_v24, %v270_v27 }
  0xcd   : > { %605 = vst.msk [vmem:[%s992_s8 + $0xa0] sm:$0xff] %vm223_vm0, %v573_v25 }
  0xce   : > { %539 = vst.msk [vmem:[#allocation2 + $0xa8] sm:$0xff] %vm223_vm0, %v507_v21 }
  0xcf   : > { %v581_v28 = vld [vmem:[#allocation2 + $0xe0] sm:$0xff]  ;;  %547 = vst.msk [vmem:[#allocation2 + $0xe8] sm:$0xff] %vm223_vm0, %v515_v22 }
  0xd0   : > { %613 = vst.msk [vmem:[%s992_s8 + $0xe0] sm:$0xff] %vm223_vm0, %v581_v28  ;;  %v558_v30 = vld [vmem:[#allocation2 + $0x28] sm:$0xff] }
  0xd1   : > { %590 = vst.msk [vmem:[%s992_s8 + $0x28] sm:$0xff] %vm223_vm0, %v558_v30  ;;  %v566_v33 = vld [vmem:[#allocation2 + $0x68] sm:$0xff] }
  0xd2   : > { %598 = vst.msk [vmem:[%s992_s8 + $0x68] sm:$0xff] %vm223_vm0, %v566_v33  ;;  %v461_v35 = vpop.f32.mrf.mxu2  ;;  %v481_v36 = vpop.f32.mrf.mxu3 }
  0xd3   : > { %524 = vst.msk [vmem:[#allocation2 + $0x30] sm:$0xff] %vm223_vm0, %v492_v29  ;;  %v508_v38 = vadd.f32 %v461_v35, %v278_v32  ;;  %v423_v39 = vpop.f32.mrf.mxu0  ;;  %v443_v41 = vpop.f32.mrf.mxu1  ;;  %v516_v42 = vadd.f32 %v481_v36, %v286_v34 }
  0xd4   : > { %532 = vst.msk [vmem:[#allocation2 + $0x70] sm:$0xff] %vm223_vm0, %v500_v31  ;;  %v493_v44 = vadd.f32 %v423_v39, %v263_v37  ;;  %v501_v46 = vadd.f32 %v443_v41, %v271_v40 }
  0xd5   : > { %v574_v43 = vld [vmem:[#allocation2 + $0xa8] sm:$0xff]  ;;  %540 = vst.msk [vmem:[#allocation2 + $0xb0] sm:$0xff] %vm223_vm0, %v508_v38 }
  0xd6   : > { %606 = vst.msk [vmem:[%s992_s8 + $0xa8] sm:$0xff] %vm223_vm0, %v574_v43  ;;  %v582_v45 = vld [vmem:[#allocation2 + $0xe8] sm:$0xff] }
  0xd7   : > { %614 = vst.msk [vmem:[%s992_s8 + $0xe8] sm:$0xff] %vm223_vm0, %v582_v45 }
  0xd8   : > { %548 = vst.msk [vmem:[#allocation2 + $0xf0] sm:$0xff] %vm223_vm0, %v516_v42 }
  0xd9   : > { %525 = vst.msk [vmem:[#allocation2 + $0x38] sm:$0xff] %vm223_vm0, %v493_v44 }
  0xda   : > { %v559_v49 = vld [vmem:[#allocation2 + $0x30] sm:$0xff]  ;;  %533 = vst.msk [vmem:[#allocation2 + $0x78] sm:$0xff] %vm223_vm0, %v501_v46  ;;  %v463_v50 = vpop.f32.mrf.mxu2  ;;  %v483_v51 = vpop.f32.mrf.mxu3 }
  0xdb   : > { %591 = vst.msk [vmem:[%s992_s8 + $0x30] sm:$0xff] %vm223_vm0, %v559_v49  ;;  %v567_v52 = vld [vmem:[#allocation2 + $0x70] sm:$0xff]  ;;  %v509_v53 = vadd.f32 %v463_v50, %v279_v47  ;;  %v517_v54 = vadd.f32 %v483_v51, %v287_v48 }
  0xdc   : > { %599 = vst.msk [vmem:[%s992_s8 + $0x70] sm:$0xff] %vm223_vm0, %v567_v52  ;;  %v575_v55 = vld [vmem:[#allocation2 + $0xb0] sm:$0xff] }
  0xdd   : > { %607 = vst.msk [vmem:[%s992_s8 + $0xb0] sm:$0xff] %vm223_vm0, %v575_v55 }
  0xde   : > { %541 = vst.msk [vmem:[#allocation2 + $0xb8] sm:$0xff] %vm223_vm0, %v509_v53 }
  0xdf   : > { %v583_v56 = vld [vmem:[#allocation2 + $0xf0] sm:$0xff]  ;;  %549 = vst.msk [vmem:[#allocation2 + $0xf8] sm:$0xff] %vm223_vm0, %v517_v54 }
  0xe0   : > { %615 = vst.msk [vmem:[%s992_s8 + $0xf0] sm:$0xff] %vm223_vm0, %v583_v56  ;;  %v560_v57 = vld [vmem:[#allocation2 + $0x38] sm:$0xff] }
  0xe1   : > { %592 = vst.msk [vmem:[%s992_s8 + $0x38] sm:$0xff] %vm223_vm0, %v560_v57  ;;  %v568_v58 = vld [vmem:[#allocation2 + $0x78] sm:$0xff] }
  0xe2   : > { %600 = vst.msk [vmem:[%s992_s8 + $0x78] sm:$0xff] %vm223_vm0, %v568_v58 }
  0xe5   : > { %v576_v59 = vld [vmem:[#allocation2 + $0xb8] sm:$0xff] }
  0xe6   : > { %608 = vst.msk [vmem:[%s992_s8 + $0xb8] sm:$0xff] %vm223_vm0, %v576_v59  ;;  %v584_v60 = vld [vmem:[#allocation2 + $0xf8] sm:$0xff] }
  0xe7   : > { %616 = vst.msk [vmem:[%s992_s8 + $0xf8] sm:$0xff] %vm223_vm0, %v584_v60 }
  0xe8 PF: > { %s12_s11 = sadd.s32 1, %s803_s11   ;;  %s1100_s9 = smov %s799_s10 }
  0xe9   : > { %p9_p5 = scmp.ge.s32.totalorder %s12_s11, 5   ;;  %s1101_s10 = smov %s1103_s12 }
  0xeb   :  { %11 = sbr.rel (!%p9_p5) target bundleno = 2 (0x2), region = 69 }

</bundles_post_ra>
